<compile_context>
chip_gen: v5e
topology: v5e:2x2
jax: 0.10.0
libtpu: 0.0.40
codegen_flags: <defaults>
</compile_context>

<pallas_src>
import functools
import math

import jax
import jax.numpy as jnp
from jax.experimental import pallas as pl
from jax.experimental.pallas import tpu as pltpu


def _edge_filter_kernel(w_ref, m_ref, x_ref, o_ref, *, W, compute_dtype):
    """Depthwise 3x3 'same' cross-correlation on a block of flattened planes.

    w_ref : SMEM (3, 3) float32 filter (shared across all planes/channels).
    m_ref : VMEM (4, L) 0/1 boundary masks in compute dtype
            (rows: keep-if-not-last-row, keep-if-not-first-row,
                   keep-if-col<=W-2,    keep-if-col>=1).
    x_ref : VMEM (B, L) block -- each sublane row is one full (H, W) plane,
            row-major flattened so the lane axis is L = H*W (lane-dense).
    o_ref : VMEM (B, L) output block, same layout.
    """
    _, L = x_ref.shape
    cdt = compute_dtype

    x = x_ref[...].astype(cdt)

    # Precomputed boundary masks (built once in the wrapper, not per grid step).
    m = m_ref[...]
    m_up, m_down, m_left, m_right = m[0:1], m[1:2], m[2:3], m[3:4]

    # Filter taps: 9 SMEM scalar reads, hoisted above all vector work.
    w00 = w_ref[0, 0].astype(cdt); w01 = w_ref[0, 1].astype(cdt); w02 = w_ref[0, 2].astype(cdt)
    w10 = w_ref[1, 0].astype(cdt); w11 = w_ref[1, 1].astype(cdt); w12 = w_ref[1, 2].astype(cdt)
    w20 = w_ref[2, 0].astype(cdt); w21 = w_ref[2, 1].astype(cdt); w22 = w_ref[2, 2].astype(cdt)

    def shifted(y, offset):
        # out[k] = y[k + offset] (circular); np.roll semantics: out[k] = y[k - s].
        s = (-offset) % L
        return pltpu.roll(y, s, axis=1) if s else y

    # Vertical (di) shifts: lane rolls by +-W inside each plane.  The source row
    # that must never contribute is zeroed *before* the roll (mask multiply), so
    # the circular wrap-around only ever carries zeros (== the zero padding).
    r_up   = shifted(x * m_up, -W)     # row i-1 (zero for i == 0)
    r_down = shifted(x * m_down, W)    # row i+1 (zero for i == H-1)

    # dj == 1 (no lane shift, no column mask) seeds the accumulator.
    acc = (r_up * w01 + x * w11 + r_down * w21).astype(jnp.float32)
    # dj == 0: contribution of column j-1 (column mask applied before the shift
    # so nothing bleeds across a row boundary -> acts as the zero-pad column).
    s0 = (r_up * w00 + x * w10 + r_down * w20) * m_left
    acc = acc + shifted(s0, -1).astype(jnp.float32)
    # dj == 2: contribution of column j+1.
    s2 = (r_up * w02 + x * w12 + r_down * w22) * m_right
    acc = acc + shifted(s2, 1).astype(jnp.float32)

    o_ref[...] = acc.astype(o_ref.dtype)


def cpp_edge_filter(x, fx, *, plane_block=None, per_buffer_bytes=512 * 1024):
    """x: (N, C, H, W), fx: (3, 3) -> (N, C, H, W) depthwise 3x3 'same' conv."""
    N, C, H, W = x.shape
    P = N * C
    L = H * W

    # bf16 inputs: bf16 I/O (half HBM traffic) + bf16 MACs with f32 accumulation
    # of the three partial sums; everything else computes in f32.
    cdt = jnp.bfloat16 if x.dtype == jnp.bfloat16 else jnp.float32

    # (N, C, H, W) -> (P, H*W): contiguous collapse (no HBM traffic); the lane
    # axis becomes H*W instead of W, so stores are full-lane even for small W.
    x2 = x.reshape(P, L)

    # Planes per grid step: ~512 KiB per buffer (measured >=85% of HBM roofline
    # at this size), multiple of 8 sublanes, and capped so realistic shapes get
    # >= ~8 grid steps for DMA/compute overlap.
    if plane_block is None:
        plane_bytes = max(L * x.dtype.itemsize, 1)
        b = max(8, (per_buffer_bytes // plane_bytes) // 8 * 8)
        if P >= 64:
            b = min(b, max(8, (P // 8) // 8 * 8))   # keep the grid >= ~8 steps
        plane_block = b
    B = plane_block if plane_block < P else P
    # TODO(synk): for planes so large that even 8 of them blow the per-buffer
    # budget (roughly > 1k x 1k f32), tile H with a 1-row halo instead of
    # whole planes so v7x (32 MiB scoped VMEM) can still double-buffer.

    grid = (pl.cdiv(P, B),)

    # Boundary masks built once (0/1 in compute dtype), reused every grid step.
    lane = jnp.arange(L, dtype=jnp.int32)
    row, col = lane // W, lane % W
    masks = jnp.stack([row < H - 1, row >= 1, col <= W - 2, col >= 1]).astype(cdt)

    # Generation-aware explicit VMEM budget: double-buffered in+out blocks,
    # ~a dozen live full-block f32 temporaries, masks, plus slack; capped at
    # half the physical VMEM (v7x: 64 MiB physical -> 32 MiB; v5e/v6e: 64 MiB).
    blk_bytes = B * L * x.dtype.itemsize
    need = 4 * blk_bytes + 12 * B * L * 4 \
        + 2 * int(masks.size) * masks.dtype.itemsize + (2 << 20)
    try:
        cap = int(pltpu.get_tpu_info().vmem_capacity_bytes) // 2
    except Exception:  # pragma: no cover - fall back to the v7x scoped default
        cap = 32 * 1024 * 1024
    vmem_limit = int(min(max(need, 8 << 20), cap))

    kernel = functools.partial(_edge_filter_kernel, W=W, compute_dtype=cdt)

    out = pl.pallas_call(
        kernel,
        out_shape=jax.ShapeDtypeStruct((P, L), x.dtype),
        grid=grid,
        in_specs=[
            # 3x3 filter lives in SMEM (scalar-broadcast reads in the kernel).
            pl.BlockSpec(memory_space=pltpu.MemorySpace.SMEM),
            # Tiny constant mask block: same block index every step, so the
            # pipeline does not refetch it.
            pl.BlockSpec((4, L), lambda i: (0, 0)),
            # B whole planes per grid step, lane-dense.
            pl.BlockSpec((B, L), lambda i: (i, 0)),
        ],
        out_specs=pl.BlockSpec((B, L), lambda i: (i, 0)),
        compiler_params=pltpu.CompilerParams(
            # "parallel": lets v7x shard the plane axis over both TensorCores
            # (no-op on single-TC v5e/v6e).
            dimension_semantics=("parallel",),
            vmem_limit_bytes=vmem_limit,
        ),
    )(fx.astype(jnp.float32), masks, x2)
    return out.reshape(N, C, H, W)


def init_fx(key):
    """Deterministic kaiming_uniform_(a=sqrt(3)) init for a (1,1,3,3) filter."""
    a = math.sqrt(3.0)
    fan_in = 1 * 3 * 3
    gain = math.sqrt(2.0 / (1.0 + a * a))
    bound = gain * math.sqrt(3.0 / fan_in)
    return jax.random.uniform(key, (1, 1, 3, 3), jnp.float32, -bound, bound)


def _reference(x, fx):
    """Pure-JAX reference: depthwise 3x3 same cross-correlation."""
    N, C, H, W = x.shape
    w = jnp.broadcast_to(fx[None, None, :, :], (C, 1, 3, 3))
    return jax.lax.conv_general_dilated(
        x, w, window_strides=(1, 1), padding=((1, 1), (1, 1)),
        dimension_numbers=("NCHW", "OIHW", "NCHW"), feature_group_count=C,
    )


if __name__ == "__main__":
    key = jax.random.PRNGKey(0)
    kx, kw = jax.random.split(key)

    x = jax.random.normal(kx, (2, 4, 16, 16), jnp.float32)
    fx_param = init_fx(kw)              # (1, 1, 3, 3) parameter, as in __init__
    fx = fx_param[0, 0]                 # .squeeze(0).squeeze(0) -> (3, 3)

    out = jax.block_until_ready(cpp_edge_filter(x, fx))

    ref = _reference(x, fx)
    assert out.shape == x.shape and out.dtype == x.dtype
    assert jnp.allclose(out, ref, atol=1e-5, rtol=1e-5)

    print("KERNEL_OK")
</pallas_src>

<mosaic_0001>
module attributes {stable_mosaic.version = 11 : i64} {
  func.func @_edge_filter_kernel(%arg0: i32, %arg1: memref<3x3xf32, #tpu.memory_space<smem>>, %arg2: memref<4x256xf32, #tpu.memory_space<vmem>>, %arg3: memref<8x256xf32, #tpu.memory_space<vmem>>, %arg4: memref<8x256xf32, #tpu.memory_space<vmem>>) attributes {dimension_semantics = [#tpu.dimension_semantics<parallel>], iteration_bounds = array<i64: 1>, scalar_prefetch = 0 : i64, scratch_operands = 0 : i64, tpu.core_type = #tpu.core_type<tc>, window_params = [{transform_indices = @transform_0, window_bounds = array<i64: 3, 3>}, {pipeline_mode = #tpu.pipeline_mode<synchronous>, transform_indices = @transform_1, window_bounds = array<i64: 4, 256>}, {transform_indices = @transform_2, window_bounds = array<i64: 8, 256>}, {transform_indices = @transform_3, window_bounds = array<i64: 8, 256>}]} {
    %c0 = arith.constant 0 : index
    %c0_0 = arith.constant 0 : index
    %0 = vector.load %arg3[%c0, %c0_0] : memref<8x256xf32, #tpu.memory_space<vmem>>, vector<8x256xf32>
    %c0_1 = arith.constant 0 : index
    %c0_2 = arith.constant 0 : index
    %1 = vector.load %arg2[%c0_1, %c0_2] : memref<4x256xf32, #tpu.memory_space<vmem>>, vector<4x256xf32>
    %2 = vector.extract_strided_slice %1 {offsets = [0, 0], sizes = [1, 256], strides = [1, 1]} : vector<4x256xf32> to vector<1x256xf32>
    %3 = vector.extract_strided_slice %1 {offsets = [1, 0], sizes = [1, 256], strides = [1, 1]} : vector<4x256xf32> to vector<1x256xf32>
    %4 = vector.extract_strided_slice %1 {offsets = [2, 0], sizes = [1, 256], strides = [1, 1]} : vector<4x256xf32> to vector<1x256xf32>
    %5 = vector.extract_strided_slice %1 {offsets = [3, 0], sizes = [1, 256], strides = [1, 1]} : vector<4x256xf32> to vector<1x256xf32>
    %c0_3 = arith.constant 0 : index
    %c0_4 = arith.constant 0 : index
    %6 = memref.load %arg1[%c0_3, %c0_4] : memref<3x3xf32, #tpu.memory_space<smem>>
    %c0_5 = arith.constant 0 : index
    %c1 = arith.constant 1 : index
    %7 = memref.load %arg1[%c0_5, %c1] : memref<3x3xf32, #tpu.memory_space<smem>>
    %c0_6 = arith.constant 0 : index
    %c2 = arith.constant 2 : index
    %8 = memref.load %arg1[%c0_6, %c2] : memref<3x3xf32, #tpu.memory_space<smem>>
    %c1_7 = arith.constant 1 : index
    %c0_8 = arith.constant 0 : index
    %9 = memref.load %arg1[%c1_7, %c0_8] : memref<3x3xf32, #tpu.memory_space<smem>>
    %c1_9 = arith.constant 1 : index
    %c1_10 = arith.constant 1 : index
    %10 = memref.load %arg1[%c1_9, %c1_10] : memref<3x3xf32, #tpu.memory_space<smem>>
    %c1_11 = arith.constant 1 : index
    %c2_12 = arith.constant 2 : index
    %11 = memref.load %arg1[%c1_11, %c2_12] : memref<3x3xf32, #tpu.memory_space<smem>>
    %c2_13 = arith.constant 2 : index
    %c0_14 = arith.constant 0 : index
    %12 = memref.load %arg1[%c2_13, %c0_14] : memref<3x3xf32, #tpu.memory_space<smem>>
    %c2_15 = arith.constant 2 : index
    %c1_16 = arith.constant 1 : index
    %13 = memref.load %arg1[%c2_15, %c1_16] : memref<3x3xf32, #tpu.memory_space<smem>>
    %c2_17 = arith.constant 2 : index
    %c2_18 = arith.constant 2 : index
    %14 = memref.load %arg1[%c2_17, %c2_18] : memref<3x3xf32, #tpu.memory_space<smem>>
    %15 = vector.broadcast %2 : vector<1x256xf32> to vector<8x256xf32>
    %16 = arith.mulf %0, %15 : vector<8x256xf32>
    %c16_i32 = arith.constant 16 : i32
    %17 = tpu.dynamic_rotate %16 by %c16_i32 dim 1 : vector<8x256xf32>, i32 -> vector<8x256xf32>
    %18 = vector.broadcast %3 : vector<1x256xf32> to vector<8x256xf32>
    %19 = arith.mulf %0, %18 : vector<8x256xf32>
    %c240_i32 = arith.constant 240 : i32
    %20 = tpu.dynamic_rotate %19 by %c240_i32 dim 1 : vector<8x256xf32>, i32 -> vector<8x256xf32>
    %21 = vector.broadcast %7 : f32 to vector<8x256xf32>
    %22 = arith.mulf %17, %21 : vector<8x256xf32>
    %23 = vector.broadcast %10 : f32 to vector<8x256xf32>
    %24 = arith.mulf %0, %23 : vector<8x256xf32>
    %25 = arith.addf %22, %24 : vector<8x256xf32>
    %26 = vector.broadcast %13 : f32 to vector<8x256xf32>
    %27 = arith.mulf %20, %26 : vector<8x256xf32>
    %28 = arith.addf %25, %27 : vector<8x256xf32>
    %29 = vector.broadcast %6 : f32 to vector<8x256xf32>
    %30 = arith.mulf %17, %29 : vector<8x256xf32>
    %31 = vector.broadcast %9 : f32 to vector<8x256xf32>
    %32 = arith.mulf %0, %31 : vector<8x256xf32>
    %33 = arith.addf %30, %32 : vector<8x256xf32>
    %34 = vector.broadcast %12 : f32 to vector<8x256xf32>
    %35 = arith.mulf %20, %34 : vector<8x256xf32>
    %36 = arith.addf %33, %35 : vector<8x256xf32>
    %37 = vector.broadcast %4 : vector<1x256xf32> to vector<8x256xf32>
    %38 = arith.mulf %36, %37 : vector<8x256xf32>
    %c1_i32 = arith.constant 1 : i32
    %39 = tpu.dynamic_rotate %38 by %c1_i32 dim 1 : vector<8x256xf32>, i32 -> vector<8x256xf32>
    %40 = arith.addf %28, %39 : vector<8x256xf32>
    %41 = vector.broadcast %8 : f32 to vector<8x256xf32>
    %42 = arith.mulf %17, %41 : vector<8x256xf32>
    %43 = vector.broadcast %11 : f32 to vector<8x256xf32>
    %44 = arith.mulf %0, %43 : vector<8x256xf32>
    %45 = arith.addf %42, %44 : vector<8x256xf32>
    %46 = vector.broadcast %14 : f32 to vector<8x256xf32>
    %47 = arith.mulf %20, %46 : vector<8x256xf32>
    %48 = arith.addf %45, %47 : vector<8x256xf32>
    %49 = vector.broadcast %5 : vector<1x256xf32> to vector<8x256xf32>
    %50 = arith.mulf %48, %49 : vector<8x256xf32>
    %c255_i32 = arith.constant 255 : i32
    %51 = tpu.dynamic_rotate %50 by %c255_i32 dim 1 : vector<8x256xf32>, i32 -> vector<8x256xf32>
    %52 = arith.addf %40, %51 : vector<8x256xf32>
    %c0_19 = arith.constant 0 : index
    %c0_20 = arith.constant 0 : index
    %53 = vector.load %arg4[%c0_19, %c0_20] : memref<8x256xf32, #tpu.memory_space<vmem>>, vector<8x256xf32>
    tpu.vector_store %arg4[%c0_19, %c0_20], %52 {strides = array<i32>} : memref<8x256xf32, #tpu.memory_space<vmem>>, vector<8x256xf32>,
    return
  }
  func.func @transform_0(%arg0: i32) -> (i32, i32) {
    %c0_i32 = arith.constant 0 : i32
    %c0_i32_0 = arith.constant 0 : i32
    %c0_i32_1 = arith.constant 0 : i32
    return %c0_i32, %c0_i32_0 : i32, i32
  }
  func.func @transform_1(%arg0: i32) -> (i32, i32) {
    %c0_i32 = arith.constant 0 : i32
    %c0_i32_0 = arith.constant 0 : i32
    %c0_i32_1 = arith.constant 0 : i32
    return %c0_i32, %c0_i32_0 : i32, i32
  }
  func.func @transform_2(%arg0: i32) -> (i32, i32) {
    %c0_i32 = arith.constant 0 : i32
    %c0_i32_0 = arith.constant 0 : i32
    return %arg0, %c0_i32 : i32, i32
  }
  func.func @transform_3(%arg0: i32) -> (i32, i32) {
    %c0_i32 = arith.constant 0 : i32
    %c0_i32_0 = arith.constant 0 : i32
    return %arg0, %c0_i32 : i32, i32
  }
}

</mosaic_0001>

<bundles_post_ra>
// kernel: tpu_custom_call.1
= control target key start
LH: loop header
LB: loop body
LE: loop exit
PB: predicated region body
PF: predicated region fallthrough
CT: control target
= control target key end

     0   :  { %8 = vsyncpa [#allocation5], 0  ;;  %s388_s0 = inlined_call_operand.hbm [shape: f32[3,3], index: 0, kind: input, shape index: {}]   ;;  %s389_s1 = inlined_call_operand.hbm [shape: f32[4,256], index: 1, kind: input, shape index: {}]   ;;  %s390_s2 = inlined_call_operand.hbm [shape: f32[8,256], index: 2, kind: input, shape index: {}]   ;;  %s391_s3 = inlined_call_operand.hbm [shape: f32[8,256], index: 3, kind: output, shape index: {}]  }
   0x1   :  { %9 = vsyncpa [#allocation3], 0 }
   0x2   :  { %10 = vsyncpa [#allocation8], 0 }
   0x3   :  { %11 = vsyncpa [#allocation4], 0  ;;  %s17_s14 = sshll.u32 %s388_s0, 4  ;;  %s26_s17 = sshll.u32 %s389_s1, 4  ;;  %s18_s14 = int_to_ptr.hbm [resolvable:$true] %s17_s14  ;;  %s27_s17 = int_to_ptr.hbm [resolvable:$true] %s26_s17 }
   0x4   :  { %s303_s18 = smov [#allocation2]   ;;  %s304_s19 = smov [#allocation6]  }
   0x5   :  { %20 = dma.hbm_to_smem %s18_s14, 64, %s303_s18, [#allocation5]  }
   0x6   :  { %s28_s20 = sshll.u32 %s304_s19, 4  ;;  %s37_s23 = sshll.u32 %s390_s2, 4  ;;  %s29_s20 = int_to_ptr.vmem [resolvable:$true] %s28_s20  ;;  %s38_s23 = int_to_ptr.hbm [resolvable:$true] %s37_s23 }
   0x7   :  { %31 = dma.hbm_to_vmem [thread:$0]  %s27_s17, 128, %s29_s20, [#allocation3]  }
   0x8   :  { %s305_s24 = smov [#allocation7]  }
   0x9   :  { %s39_s25 = sshll.u32 %s305_s24, 4  ;;  %s40_s25 = int_to_ptr.vmem [resolvable:$true] %s39_s25 }
   0xa   :  { %42 = dma.hbm_to_vmem [thread:$0]  %s38_s23, 256, %s40_s25, [#allocation8]  }
   0xb   :  { %295 = dma.done.wait [#allocation5], 64  }
   0xc   :  { %296 = vsyncadd [#allocation5], 4294967232 }
   0xd   :  { %297 = dma.done.wait [#allocation3], 128  }
   0xe   :  { %298 = vsyncadd [#allocation3], 4294967168 }
   0xf   :  { %299 = dma.done.wait [#allocation8], 256  }
  0x10   :  { %300 = vsyncadd [#allocation8], 4294967040 }
  0x11   :  { %55 = sfence }
  0x12   :  { %v340_v0 = vld [vmem:[#allocation6] sm:$0xff]  ;;  %v56_v3 = vld [vmem:[#allocation7] sm:$0xff]  ;;  %s306_s0 = smov 112   ;;  %s307_s1 = smov 16   ;;  %v57_v12 = vld [vmem:[#allocation7 + $0x8] sm:$0xff]  ;;  %v81_v15 = vlaneseq }
  0x13   :  { %v86_v1 = vperm.slane %v340_v0, 1  ;;  %v69_v2 = vperm.slane %v340_v0, 0  ;;  %v87_v6 = vperm.slane %v340_v0, 5  ;;  %v70_v7 = vperm.slane %v340_v0, 4  ;;  %s346_s2 = sld [smem:[#allocation2 + $0x100]]  ;;  %s308_s7 = smov 127  }
  0x14   :  { %s348_s26 = sld [smem:[#allocation2 + $0x101]]  ;;  %v360_v18 = vand.u32 127, %v81_v15  ;;  %v157_v25 = vperm.slane %v340_v0, 3  ;;  %v127_v26 = vperm.slane %v340_v0, 2  ;;  %v158_v27 = vperm.slane %v340_v0, 7  ;;  %s309_s8 = smov 1  }
  0x15   :  { %v90_v4 = vperm.slane %v86_v1, 1  ;;  %v73_v5 = vperm.slane %v69_v2, 0  ;;  %v91_v10 = vperm.slane %v87_v6, 1  ;;  %v74_v11 = vperm.slane %v70_v7, 0  ;;  %s350_s27 = sld [smem:[#allocation2 + $0x102]]  ;;  %s310_s9 = smov [#allocation9]  }
  0x16   :  { %s197_s28 = sld [smem:[#allocation2 + $0x80]]  ;;  %vm98_vm0 = vcmp.lt.s32.totalorder %v360_v18, 112  ;;  %vm83_vm1 = vcmp.lt.s32.totalorder %v360_v18, 16  ;;  %v161_v43 = vperm.slane %v157_v25, 3  ;;  %v131_v44 = vperm.slane %v127_v26, 2  ;;  %s181_s10 = sshll.u32 %s310_s9, 4  ;;  %s182_s10 = int_to_ptr.vmem [resolvable:$true] %s181_s10 }
  0x17   :  { %v92_v8 = vmul.f32 %v90_v4, %v56_v3  ;;  %v75_v9 = vmul.f32 %v73_v5, %v56_v3  ;;  %v93_v13 = vmul.f32 %v91_v10, %v57_v12  ;;  %v76_v14 = vmul.f32 %v74_v11, %v57_v12  ;;  %s198_s29 = sld [smem:[#allocation2 + $0x81]]  ;;  %s183_s13 = sshll.u32 %s391_s3, 4  ;;  %s184_s13 = int_to_ptr.hbm [resolvable:$true] %s183_s13 }
  0x18   :  { %s352_s30 = sld [smem:[#allocation2 + $0x82]]  ;;  %v162_v45 = vperm.slane %v158_v27, 3  ;;  %v128_v4 = vperm.slane %v340_v0, 6  ;;  %vm139_vm2 = vcmp.lt.s32.totalorder %v360_v18, 1  ;;  %vm169_vm3 = vcmp.lt.s32.totalorder %v360_v18, 127 }
  0x19   :  { %94 = vrot.lane.b32.xlu1 %v92_v8, %s306_s0  ;;  %77 = vrot.lane.b32.xlu0 %v75_v9, %s307_s1  ;;  %s354_s4 = sld [smem:[#allocation2]]  ;;  %v122_v20 = vstv %s346_s2 }
  0x1a   :  { %s356_s5 = sld [smem:[#allocation2 + $0x1]]  ;;  %v109_v19 = vstv %s348_s26  ;;  %v132_v11 = vperm.slane %v128_v4, 2 }
  0x1b   :  { %s358_s6 = sld [smem:[#allocation2 + $0x2]]  ;;  %v152_v22 = vstv %s350_s27 }
  0x1c   :  { %v117_v23 = vstv %s197_s28 }
  0x1d   :  { %v104_v21 = vstv %s198_s29  ;;  %v119_v33 = vmul.f32 %v117_v23, %v57_v12  ;;  %v118_v37 = vmul.f32 %v117_v23, %v56_v3 }
  0x1e   :  { %v147_v24 = vstv %s352_s30  ;;  %v105_v29 = vmul.f32 %v104_v21, %v56_v3  ;;  %v106_v30 = vmul.f32 %v104_v21, %v57_v12 }
  0x1f   :  { %v114_v31 = vstv %s354_s4  ;;  %v148_v35 = vmul.f32 %v147_v24, %v56_v3  ;;  %v149_v42 = vmul.f32 %v147_v24, %v57_v12 }
  0x20   :  { %v101_v28 = vstv %s356_s5 }
  0x21   :  { %96 = vrot.lane.b32.xlu1 %v93_v13, %s306_s0  ;;  %79 = vrot.lane.b32.xlu0 %v76_v14, %s307_s1  ;;  %v144_v34 = vstv %s358_s6 }
  0x8b   :  { %v95_v16 = vpop.permute.xlu1 %94  ;;  %v78_v17 = vpop.permute.xlu0 %77 }
  0x93   :  { %v97_v32 = vpop.permute.xlu1 %96  ;;  %v80_v36 = vpop.permute.xlu0 %79 }
  0x94   :  { %v99_v38 = vsel %vm98_vm0, %v95_v16, %v97_v32  ;;  %v100_v39 = vsel %vm98_vm0, %v97_v32, %v95_v16  ;;  %v84_v40 = vsel %vm83_vm1, %v78_v17, %v80_v36  ;;  %v85_v41 = vsel %vm83_vm1, %v80_v36, %v78_v17 }
  0x95   :  { %v110_v46 = vmul.f32 %v109_v19, %v99_v38  ;;  %v111_v47 = vmul.f32 %v109_v19, %v100_v39  ;;  %v102_v48 = vmul.f32 %v101_v28, %v85_v41  ;;  %v103_v49 = vmul.f32 %v101_v28, %v84_v40 }
  0x96   :  { %v123_v50 = vmul.f32 %v122_v20, %v99_v38  ;;  %v115_v51 = vmul.f32 %v114_v31, %v85_v41  ;;  %v145_v52 = vmul.f32 %v144_v34, %v85_v41  ;;  %v146_v53 = vmul.f32 %v144_v34, %v84_v40 }
  0x97   :  { %v153_v54 = vmul.f32 %v152_v22, %v99_v38  ;;  %v154_v55 = vmul.f32 %v152_v22, %v100_v39  ;;  %v107_v56 = vadd.f32 %v105_v29, %v102_v48  ;;  %v108_v57 = vadd.f32 %v106_v30, %v103_v49 }
  0x98   :  { %v116_v58 = vmul.f32 %v114_v31, %v84_v40  ;;  %v150_v59 = vadd.f32 %v148_v35, %v145_v52  ;;  %v151_v60 = vadd.f32 %v149_v42, %v146_v53  ;;  %v120_v61 = vadd.f32 %v118_v37, %v115_v51 }
  0x99   :  { %v112_v62 = vadd.f32 %v110_v46, %v107_v56  ;;  %v113_v63 = vadd.f32 %v111_v47, %v108_v57  ;;  %v124_v9 = vmul.f32 %v122_v20, %v100_v39 }
  0x9a   :  { %v155_v1 = vadd.f32 %v153_v54, %v150_v59  ;;  %v125_v2 = vadd.f32 %v123_v50, %v120_v61  ;;  %v156_v3 = vadd.f32 %v154_v55, %v151_v60  ;;  %v121_v5 = vadd.f32 %v119_v33, %v116_v58 }
  0x9c   :  { %v163_v6 = vmul.f32 %v161_v43, %v155_v1  ;;  %v133_v7 = vmul.f32 %v131_v44, %v125_v2  ;;  %v164_v8 = vmul.f32 %v162_v45, %v156_v3  ;;  %v126_v10 = vadd.f32 %v124_v9, %v121_v5 }
  0x9e   :  { %165 = vrot.lane.b32.xlu0 %v163_v6, %s308_s7  ;;  %135 = vrot.lane.b32.xlu2 %v133_v7, %s309_s8  ;;  %v134_v12 = vmul.f32 %v132_v11, %v126_v10 }
  0x9f   :  { %167 = vrot.lane.b32.xlu1 %v164_v8, %s308_s7 }
  0xa6   :  { %137 = vrot.lane.b32.xlu2 %v134_v12, %s309_s8 }
  0xf8   :  { %v136_v13 = vpop.permute.xlu2 %135 }
 0x100   :  { %v138_v14 = vpop.permute.xlu2 %137 }
 0x101   :  { %v140_v15 = vsel %vm139_vm2, %v136_v13, %v138_v14  ;;  %v141_v0 = vsel %vm139_vm2, %v138_v14, %v136_v13 }
 0x102   :  { %v142_v17 = vadd.f32 %v141_v0, %v112_v62  ;;  %v143_v19 = vadd.f32 %v140_v15, %v113_v63 }
 0x110   :  { %v166_v16 = vpop.permute.xlu0 %165 }
 0x111   :  { %v168_v20 = vpop.permute.xlu1 %167 }
 0x112   :  { %v170_v21 = vsel %vm169_vm3, %v166_v16, %v168_v20  ;;  %v171_v22 = vsel %vm169_vm3, %v168_v20, %v166_v16 }
 0x113   :  { %v172_v23 = vadd.f32 %v170_v21, %v142_v17  ;;  %v173_v24 = vadd.f32 %v171_v22, %v143_v19 }
 0x115   :  { %174 = vst [vmem:[#allocation9] sm:$0xff] %v172_v23 }
 0x116   :  { %175 = vst [vmem:[#allocation9 + $0x8] sm:$0xff] %v173_v24 }
 0x117   :  { %186 = dma.vmem_to_hbm [thread:$0]  %s182_s10, 256, %s184_s13, [#allocation4]  }
 0x118   :  { %301 = dma.done.wait [#allocation4], 256  }
 0x119   :  { %302 = vsyncadd [#allocation4], 4294967040 }
 0x11a   :  { %191 = vsyncpa [#allocation3], 1 }
 0x11b   :  { %192 = vsyncpa [#allocation8], 1 }
 0x11c   :  { %193 = vsyncpa [#allocation4], 1 }
 0x11d   :  { %194 = vsyncpa [#allocation5], 1 }

</bundles_post_ra>
